<compile_context>
chip_gen: v5e
topology: v5e:2x2
jax: 0.10.0
libtpu: 0.0.40
codegen_flags: <defaults>
</compile_context>

<pallas_src>
import functools
import math

import jax
import jax.numpy as jnp
from jax.experimental import pallas as pl
from jax.experimental.pallas import tpu as pltpu

EPS = 1e-6


def encoder_layer_kernel(x_ref, bias_ref,
                         wqkv_ref, wo_ref,
                         w1_ref, b1_ref, w2_ref, b2_ref,
                         a1_ref, g1_ref, a2_ref, g2_ref,
                         o_ref, *, n_heads):
    """One batch element per grid step.

    x_ref    : (1, S, D) bf16 activations for this batch element
    bias_ref : (S, S) f32 additive attention bias (0 = attend, -1e9 = masked)
    wqkv_ref : (D, 3D) bf16 concatenated [wq/sqrt(d_k) | wk | wv]
    wo_ref   : (D, D) bf16
    w1, w2   : (D, F) / (F, D) bf16 ; b1, b2 : (1, F) / (1, D) f32
    a*, g*   : (1, D) f32 LayerNorm alpha / bias
    """
    x = x_ref[0].astype(jnp.float32)                       # (S, D) f32
    S, D = x.shape
    H = n_heads
    d_k = D // H

    def layer_norm(v, alpha, beta):
        # torch.std default is unbiased (divide by D-1); eps added to std.
        mean = jnp.mean(v, axis=-1, keepdims=True)
        var = jnp.sum((v - mean) ** 2, axis=-1, keepdims=True) * (1.0 / (D - 1))
        return alpha * (v - mean) / (jnp.sqrt(var) + EPS) + beta   # exact divide

    # ---- residual connection 0: self-attention on the pre-normed input ----
    n1 = layer_norm(x, a1_ref[...], g1_ref[...])                   # (S, D) f32
    # Fused lane-dense QKV projection: (S, D) @ (D, 3D), bf16 in, f32 acc.
    qkv = jnp.dot(n1.astype(jnp.bfloat16), wqkv_ref[...],
                  preferred_element_type=jnp.float32)              # (S, 3D)

    def split_heads(off):
        # (S, 3D) column range -> (H, S, d_k) via static lane slices (no
        # duplicated activation copies, no in-kernel minor-dim transpose).
        return jnp.stack(
            [qkv[:, off + h * d_k: off + (h + 1) * d_k] for h in range(H)],
            axis=0)

    q = split_heads(0 * D).astype(jnp.bfloat16)            # already 1/sqrt(d_k)-scaled
    k = split_heads(1 * D).astype(jnp.bfloat16)
    v = split_heads(2 * D).astype(jnp.bfloat16)

    # Batched-over-heads scores: (H, S, S), f32 accumulation on the MXU.
    scores = jnp.einsum('hqe,hke->hqk', q, k,
                        preferred_element_type=jnp.float32)
    scores = scores + bias_ref[...][None]                  # additive mask bias

    # Softmax in f32 (v5e-safe); denominator reciprocal on the EUP slot.
    m = jnp.max(scores, axis=-1, keepdims=True)
    p = jnp.exp(scores - m)
    p = p * pl.reciprocal(jnp.sum(p, axis=-1, keepdims=True), approx=True)

    ctx = jnp.einsum('hqk,hke->hqe', p.astype(jnp.bfloat16), v,
                     preferred_element_type=jnp.float32)   # (H, S, d_k)

    # Concat-heads back to lane-dense (S, D); one K=D matmul does the
    # per-head projection AND the head-sum inside the systolic array.
    ctx_cat = jnp.concatenate([ctx[h] for h in range(H)], axis=-1)  # (S, D)
    attn = jnp.dot(ctx_cat.astype(jnp.bfloat16), wo_ref[...],
                   preferred_element_type=jnp.float32)     # (S, D)
    x1 = x + attn                                          # dropout = identity

    # ---- residual connection 1: feed-forward on the pre-normed input ----
    n2 = layer_norm(x1, a2_ref[...], g2_ref[...])
    hdn = jnp.dot(n2.astype(jnp.bfloat16), w1_ref[...],
                  preferred_element_type=jnp.float32) + b1_ref[...]
    hdn = jnp.maximum(hdn, 0.0)                            # ReLU in f32 (VPU)
    ffn = jnp.dot(hdn.astype(jnp.bfloat16), w2_ref[...],
                  preferred_element_type=jnp.float32) + b2_ref[...]
    # NOTE: at D=32 this store is lane-masked (32/128 lanes); moot for real D>=128.
    o_ref[0] = (x1 + ffn).astype(o_ref.dtype)


def encoder_layer(x, src_mask, params, *, n_heads):
    B, S, D = x.shape
    F = params["w1"].shape[1]
    d_k = D // n_heads
    scale = 1.0 / math.sqrt(d_k)

    # Weight prep in plain JAX, once: fold the score scale into wq, fuse the
    # three projections into one lane-dense (D, 3D) weight, cast MXU operands
    # to bf16.  Column order [q | k | v], each with heads in natural order.
    wqkv = jnp.concatenate(
        [params["wq"] * scale, params["wk"], params["wv"]], axis=1
    ).astype(jnp.bfloat16)                                 # (D, 3D)
    wo = params["wo"].astype(jnp.bfloat16)                 # (D, D)
    w1 = params["w1"].astype(jnp.bfloat16)                 # (D, F)
    w2 = params["w2"].astype(jnp.bfloat16)                 # (F, D)

    # Additive attention bias: 0 where mask==1, -1e9 where mask==0.
    bias = (src_mask.astype(jnp.float32) - 1.0) * 1e9      # (S, S)

    kernel = functools.partial(encoder_layer_kernel, n_heads=n_heads)
    const2 = lambda b: (0, 0)                              # weights stay resident

    out = pl.pallas_call(
        kernel,
        out_shape=jax.ShapeDtypeStruct((B, S, D), x.dtype),
        grid=(B,),
        in_specs=[
            pl.BlockSpec((1, S, D), lambda b: (b, 0, 0)),  # x (bf16 at boundary)
            pl.BlockSpec((S, S), const2),                  # additive mask bias
            pl.BlockSpec((D, 3 * D), const2),              # wqkv
            pl.BlockSpec((D, D), const2),                  # wo
            pl.BlockSpec((D, F), const2),                  # w1
            pl.BlockSpec((1, F), const2),                  # b1
            pl.BlockSpec((F, D), const2),                  # w2
            pl.BlockSpec((1, D), const2),                  # b2
            pl.BlockSpec((1, D), const2),                  # ln1 alpha
            pl.BlockSpec((1, D), const2),                  # ln1 bias
            pl.BlockSpec((1, D), const2),                  # ln2 alpha
            pl.BlockSpec((1, D), const2),                  # ln2 bias
        ],
        out_specs=pl.BlockSpec((1, S, D), lambda b: (b, 0, 0)),
        compiler_params=pltpu.CompilerParams(
            dimension_semantics=("parallel",)),            # batch axis: megacore
    )(x.astype(jnp.bfloat16), bias,
      wqkv, wo, w1, params["b1"], w2, params["b2"],
      params["ln1_a"], params["ln1_b"], params["ln2_a"], params["ln2_b"])
    return out


def encoder_layer_ref(x, src_mask, params, *, n_heads):
    """Pure-JAX f32 reference mirroring the PyTorch forward exactly."""
    B, S, D = x.shape
    d_k = D // n_heads

    def layer_norm(v, alpha, beta):
        mean = jnp.mean(v, axis=-1, keepdims=True)
        var = jnp.sum((v - mean) ** 2, axis=-1, keepdims=True) / (D - 1)
        std = jnp.sqrt(var)
        return alpha * (v - mean) / (std + EPS) + beta

    n1 = layer_norm(x, params["ln1_a"], params["ln1_b"])
    q = n1 @ params["wq"]
    k = n1 @ params["wk"]
    v = n1 @ params["wv"]
    q = q.reshape(B, S, n_heads, d_k).transpose(0, 2, 1, 3)
    k = k.reshape(B, S, n_heads, d_k).transpose(0, 2, 1, 3)
    v = v.reshape(B, S, n_heads, d_k).transpose(0, 2, 1, 3)
    scores = (q @ jnp.swapaxes(k, -2, -1)) / math.sqrt(d_k)
    scores = jnp.where(src_mask[None, None] == 0, -1e9, scores)
    p = jax.nn.softmax(scores, axis=-1)
    attn = (p @ v).transpose(0, 2, 1, 3).reshape(B, S, D) @ params["wo"]
    x1 = x + attn
    n2 = layer_norm(x1, params["ln2_a"], params["ln2_b"])
    ffn = jnp.maximum(n2 @ params["w1"] + params["b1"], 0.0) @ params["w2"] + params["b2"]
    return x1 + ffn


if __name__ == "__main__":
    B, S, D, H, F = 2, 8, 32, 4, 64   # batch, seq_len, d_model, heads, d_ff

    key = jax.random.PRNGKey(0)
    keys = jax.random.split(key, 10)
    params = {
        "wq": 0.05 * jax.random.normal(keys[0], (D, D), jnp.float32),
        "wk": 0.05 * jax.random.normal(keys[1], (D, D), jnp.float32),
        "wv": 0.05 * jax.random.normal(keys[2], (D, D), jnp.float32),
        "wo": 0.05 * jax.random.normal(keys[3], (D, D), jnp.float32),
        "w1": 0.05 * jax.random.normal(keys[4], (D, F), jnp.float32),
        "b1": 0.05 * jax.random.normal(keys[5], (1, F), jnp.float32),
        "w2": 0.05 * jax.random.normal(keys[6], (F, D), jnp.float32),
        "b2": 0.05 * jax.random.normal(keys[7], (1, D), jnp.float32),
        "ln1_a": jnp.ones((1, D), jnp.float32),
        "ln1_b": jnp.zeros((1, D), jnp.float32),
        "ln2_a": jnp.ones((1, D), jnp.float32),
        "ln2_b": jnp.zeros((1, D), jnp.float32),
    }

    x = jax.random.normal(keys[8], (B, S, D), jnp.float32)
    # Causal-style mask to exercise the masking path (1 = attend, 0 = masked).
    src_mask = jnp.tril(jnp.ones((S, S), jnp.float32))

    out = encoder_layer(x, src_mask, params, n_heads=H)
    jax.block_until_ready(out)

    ref = encoder_layer_ref(x, src_mask, params, n_heads=H)
    assert out.shape == (B, S, D)
    # bf16 activations/MXU inputs + approx softmax reciprocal vs f32 reference.
    assert jnp.allclose(out, ref, rtol=2e-2, atol=2e-2), "mismatch vs reference"

    print("KERNEL_OK")
</pallas_src>

<mosaic_0001>
module attributes {stable_mosaic.version = 11 : i64} {
  func.func @encoder_layer_kernel(%arg0: i32, %arg1: memref<1x8x32xbf16, #tpu.memory_space<vmem>>, %arg2: memref<8x8xf32, #tpu.memory_space<vmem>>, %arg3: memref<32x96xbf16, #tpu.memory_space<vmem>>, %arg4: memref<32x32xbf16, #tpu.memory_space<vmem>>, %arg5: memref<32x64xbf16, #tpu.memory_space<vmem>>, %arg6: memref<1x64xf32, #tpu.memory_space<vmem>>, %arg7: memref<64x32xbf16, #tpu.memory_space<vmem>>, %arg8: memref<1x32xf32, #tpu.memory_space<vmem>>, %arg9: memref<1x32xf32, #tpu.memory_space<vmem>>, %arg10: memref<1x32xf32, #tpu.memory_space<vmem>>, %arg11: memref<1x32xf32, #tpu.memory_space<vmem>>, %arg12: memref<1x32xf32, #tpu.memory_space<vmem>>, %arg13: memref<1x8x32xf32, #tpu.memory_space<vmem>>) attributes {dimension_semantics = [#tpu.dimension_semantics<parallel>], iteration_bounds = array<i64: 2>, scalar_prefetch = 0 : i64, scratch_operands = 0 : i64, tpu.core_type = #tpu.core_type<tc>, window_params = [{transform_indices = @transform_0, window_bounds = array<i64: 1, 8, 32>}, {pipeline_mode = #tpu.pipeline_mode<synchronous>, transform_indices = @transform_1, window_bounds = array<i64: 8, 8>}, {pipeline_mode = #tpu.pipeline_mode<synchronous>, transform_indices = @transform_2, window_bounds = array<i64: 32, 96>}, {pipeline_mode = #tpu.pipeline_mode<synchronous>, transform_indices = @transform_3, window_bounds = array<i64: 32, 32>}, {pipeline_mode = #tpu.pipeline_mode<synchronous>, transform_indices = @transform_4, window_bounds = array<i64: 32, 64>}, {pipeline_mode = #tpu.pipeline_mode<synchronous>, transform_indices = @transform_5, window_bounds = array<i64: 1, 64>}, {pipeline_mode = #tpu.pipeline_mode<synchronous>, transform_indices = @transform_6, window_bounds = array<i64: 64, 32>}, {pipeline_mode = #tpu.pipeline_mode<synchronous>, transform_indices = @transform_7, window_bounds = array<i64: 1, 32>}, {pipeline_mode = #tpu.pipeline_mode<synchronous>, transform_indices = @transform_8, window_bounds = array<i64: 1, 32>}, {pipeline_mode = #tpu.pipeline_mode<synchronous>, transform_indices = @transform_9, window_bounds = array<i64: 1, 32>}, {pipeline_mode = #tpu.pipeline_mode<synchronous>, transform_indices = @transform_10, window_bounds = array<i64: 1, 32>}, {pipeline_mode = #tpu.pipeline_mode<synchronous>, transform_indices = @transform_11, window_bounds = array<i64: 1, 32>}, {transform_indices = @transform_12, window_bounds = array<i64: 1, 8, 32>}]} {
    %c0 = arith.constant 0 : index
    %c0_0 = arith.constant 0 : index
    %c0_1 = arith.constant 0 : index
    %0 = vector.load %arg1[%c0, %c0_0, %c0_1] : memref<1x8x32xbf16, #tpu.memory_space<vmem>>, vector<1x8x32xbf16>
    %1 = vector.shape_cast %0 : vector<1x8x32xbf16> to vector<8x32xbf16>
    %2 = arith.extf %1 : vector<8x32xbf16> to vector<8x32xf32>
    %c0_2 = arith.constant 0 : index
    %c0_3 = arith.constant 0 : index
    %3 = vector.load %arg9[%c0_2, %c0_3] : memref<1x32xf32, #tpu.memory_space<vmem>>, vector<1x32xf32>
    %c0_4 = arith.constant 0 : index
    %c0_5 = arith.constant 0 : index
    %4 = vector.load %arg10[%c0_4, %c0_5] : memref<1x32xf32, #tpu.memory_space<vmem>>, vector<1x32xf32>
    %cst = arith.constant dense<0.000000e+00> : vector<8xf32>
    %5 = vector.multi_reduction <add>, %2, %cst [1] : vector<8x32xf32> to vector<8xf32>
    %6 = vector.shape_cast %5 : vector<8xf32> to vector<8x1xf32>
    %cst_6 = arith.constant 3.200000e+01 : f32
    %7 = vector.broadcast %cst_6 : f32 to vector<8x1xf32>
    %8 = arith.divf %6, %7 : vector<8x1xf32>
    %9 = vector.broadcast %8 : vector<8x1xf32> to vector<8x32xf32>
    %10 = arith.subf %2, %9 : vector<8x32xf32>
    %11 = arith.mulf %10, %10 : vector<8x32xf32>
    %cst_7 = arith.constant dense<0.000000e+00> : vector<8xf32>
    %12 = vector.multi_reduction <add>, %11, %cst_7 [1] : vector<8x32xf32> to vector<8xf32>
    %13 = vector.shape_cast %12 : vector<8xf32> to vector<8x1xf32>
    %cst_8 = arith.constant 0.0322580636 : f32
    %14 = vector.broadcast %cst_8 : f32 to vector<8x1xf32>
    %15 = arith.mulf %13, %14 : vector<8x1xf32>
    %16 = vector.broadcast %8 : vector<8x1xf32> to vector<8x32xf32>
    %17 = arith.subf %2, %16 : vector<8x32xf32>
    %18 = vector.broadcast %3 : vector<1x32xf32> to vector<8x32xf32>
    %19 = arith.mulf %18, %17 : vector<8x32xf32>
    %20 = math.sqrt %15 : vector<8x1xf32>
    %cst_9 = arith.constant 9.99999997E-7 : f32
    %21 = vector.broadcast %cst_9 : f32 to vector<8x1xf32>
    %22 = arith.addf %20, %21 : vector<8x1xf32>
    %23 = vector.broadcast %22 : vector<8x1xf32> to vector<8x32xf32>
    %24 = arith.divf %19, %23 : vector<8x32xf32>
    %25 = vector.broadcast %4 : vector<1x32xf32> to vector<8x32xf32>
    %26 = arith.addf %24, %25 : vector<8x32xf32>
    %27 = arith.truncf %26 : vector<8x32xf32> to vector<8x32xbf16>
    %c0_10 = arith.constant 0 : index
    %c0_11 = arith.constant 0 : index
    %28 = vector.load %arg3[%c0_10, %c0_11] : memref<32x96xbf16, #tpu.memory_space<vmem>>, vector<32x96xbf16>
    %cst_12 = arith.constant dense<0.000000e+00> : vector<8x96xf32>
    %29 = tpu.matmul %27, %28, %cst_12 {dimension_numbers = #tpu.dot_dimension_numbers<[1], [0], [0], [1], [0, 0, 1, 1], [], []>} : vector<8x32xbf16>, vector<32x96xbf16>, vector<8x96xf32> -> vector<8x96xf32>
    %30 = vector.extract_strided_slice %29 {offsets = [0, 0], sizes = [8, 8], strides = [1, 1]} : vector<8x96xf32> to vector<8x8xf32>
    %31 = vector.extract_strided_slice %29 {offsets = [0, 8], sizes = [8, 8], strides = [1, 1]} : vector<8x96xf32> to vector<8x8xf32>
    %32 = vector.extract_strided_slice %29 {offsets = [0, 16], sizes = [8, 8], strides = [1, 1]} : vector<8x96xf32> to vector<8x8xf32>
    %33 = vector.extract_strided_slice %29 {offsets = [0, 24], sizes = [8, 8], strides = [1, 1]} : vector<8x96xf32> to vector<8x8xf32>
    %34 = vector.shape_cast %30 : vector<8x8xf32> to vector<1x8x8xf32>
    %35 = vector.shape_cast %31 : vector<8x8xf32> to vector<1x8x8xf32>
    %36 = vector.shape_cast %32 : vector<8x8xf32> to vector<1x8x8xf32>
    %37 = vector.shape_cast %33 : vector<8x8xf32> to vector<1x8x8xf32>
    %38 = tpu.concatenate %34, %35, %36, %37 in 0 : vector<1x8x8xf32>, vector<1x8x8xf32>, vector<1x8x8xf32>, vector<1x8x8xf32> -> vector<4x8x8xf32>
    %39 = arith.truncf %38 : vector<4x8x8xf32> to vector<4x8x8xbf16>
    %40 = vector.extract_strided_slice %29 {offsets = [0, 32], sizes = [8, 8], strides = [1, 1]} : vector<8x96xf32> to vector<8x8xf32>
    %41 = vector.extract_strided_slice %29 {offsets = [0, 40], sizes = [8, 8], strides = [1, 1]} : vector<8x96xf32> to vector<8x8xf32>
    %42 = vector.extract_strided_slice %29 {offsets = [0, 48], sizes = [8, 8], strides = [1, 1]} : vector<8x96xf32> to vector<8x8xf32>
    %43 = vector.extract_strided_slice %29 {offsets = [0, 56], sizes = [8, 8], strides = [1, 1]} : vector<8x96xf32> to vector<8x8xf32>
    %44 = vector.shape_cast %40 : vector<8x8xf32> to vector<1x8x8xf32>
    %45 = vector.shape_cast %41 : vector<8x8xf32> to vector<1x8x8xf32>
    %46 = vector.shape_cast %42 : vector<8x8xf32> to vector<1x8x8xf32>
    %47 = vector.shape_cast %43 : vector<8x8xf32> to vector<1x8x8xf32>
    %48 = tpu.concatenate %44, %45, %46, %47 in 0 : vector<1x8x8xf32>, vector<1x8x8xf32>, vector<1x8x8xf32>, vector<1x8x8xf32> -> vector<4x8x8xf32>
    %49 = arith.truncf %48 : vector<4x8x8xf32> to vector<4x8x8xbf16>
    %50 = vector.extract_strided_slice %29 {offsets = [0, 64], sizes = [8, 8], strides = [1, 1]} : vector<8x96xf32> to vector<8x8xf32>
    %51 = vector.extract_strided_slice %29 {offsets = [0, 72], sizes = [8, 8], strides = [1, 1]} : vector<8x96xf32> to vector<8x8xf32>
    %52 = vector.extract_strided_slice %29 {offsets = [0, 80], sizes = [8, 8], strides = [1, 1]} : vector<8x96xf32> to vector<8x8xf32>
    %53 = vector.extract_strided_slice %29 {offsets = [0, 88], sizes = [8, 8], strides = [1, 1]} : vector<8x96xf32> to vector<8x8xf32>
    %54 = vector.shape_cast %50 : vector<8x8xf32> to vector<1x8x8xf32>
    %55 = vector.shape_cast %51 : vector<8x8xf32> to vector<1x8x8xf32>
    %56 = vector.shape_cast %52 : vector<8x8xf32> to vector<1x8x8xf32>
    %57 = vector.shape_cast %53 : vector<8x8xf32> to vector<1x8x8xf32>
    %58 = tpu.concatenate %54, %55, %56, %57 in 0 : vector<1x8x8xf32>, vector<1x8x8xf32>, vector<1x8x8xf32>, vector<1x8x8xf32> -> vector<4x8x8xf32>
    %59 = arith.truncf %58 : vector<4x8x8xf32> to vector<4x8x8xbf16>
    "tpu.trace_start"() <{level = 10 : i32, message = "hqe,hke->hqk"}> : () -> ()
    %cst_13 = arith.constant dense<0.000000e+00> : vector<4x8x8xf32>
    %60 = tpu.matmul %39, %49, %cst_13 {dimension_numbers = #tpu.dot_dimension_numbers<[2], [2], [1], [1], [0, 0, 0, 1, 1, 1], [0], [0]>} : vector<4x8x8xbf16>, vector<4x8x8xbf16>, vector<4x8x8xf32> -> vector<4x8x8xf32>
    "tpu.trace_stop"() : () -> ()
    %c0_14 = arith.constant 0 : index
    %c0_15 = arith.constant 0 : index
    %61 = vector.load %arg2[%c0_14, %c0_15] : memref<8x8xf32, #tpu.memory_space<vmem>>, vector<8x8xf32>
    %62 = vector.shape_cast %61 : vector<8x8xf32> to vector<1x8x8xf32>
    %63 = vector.broadcast %62 : vector<1x8x8xf32> to vector<4x8x8xf32>
    %64 = arith.addf %60, %63 : vector<4x8x8xf32>
    %cst_16 = arith.constant dense<0xFF800000> : vector<4x8xf32>
    %65 = vector.multi_reduction <maximumf>, %64, %cst_16 [2] : vector<4x8x8xf32> to vector<4x8xf32>
    %66 = vector.shape_cast %65 : vector<4x8xf32> to vector<4x8x1xf32>
    %67 = vector.broadcast %66 : vector<4x8x1xf32> to vector<4x8x8xf32>
    %68 = arith.subf %64, %67 : vector<4x8x8xf32>
    %69 = math.exp %68 : vector<4x8x8xf32>
    %cst_17 = arith.constant dense<0.000000e+00> : vector<4x8xf32>
    %70 = vector.multi_reduction <add>, %69, %cst_17 [2] : vector<4x8x8xf32> to vector<4x8xf32>
    %71 = vector.shape_cast %70 : vector<4x8xf32> to vector<4x8x1xf32>
    %72 = tpu.reciprocal %71 {approx = true} : vector<4x8x1xf32> -> vector<4x8x1xf32>
    %73 = vector.broadcast %72 : vector<4x8x1xf32> to vector<4x8x8xf32>
    %74 = arith.mulf %69, %73 : vector<4x8x8xf32>
    %75 = arith.truncf %74 : vector<4x8x8xf32> to vector<4x8x8xbf16>
    "tpu.trace_start"() <{level = 10 : i32, message = "hqk,hke->hqe"}> : () -> ()
    %cst_18 = arith.constant dense<0.000000e+00> : vector<4x8x8xf32>
    %76 = tpu.matmul %75, %59, %cst_18 {dimension_numbers = #tpu.dot_dimension_numbers<[2], [1], [1], [2], [0, 0, 0, 1, 1, 2], [0], [0]>} : vector<4x8x8xbf16>, vector<4x8x8xbf16>, vector<4x8x8xf32> -> vector<4x8x8xf32>
    "tpu.trace_stop"() : () -> ()
    %77 = vector.extract_strided_slice %76 {offsets = [0, 0, 0], sizes = [1, 8, 8], strides = [1, 1, 1]} : vector<4x8x8xf32> to vector<1x8x8xf32>
    %78 = vector.shape_cast %77 : vector<1x8x8xf32> to vector<8x8xf32>
    %79 = vector.extract_strided_slice %76 {offsets = [1, 0, 0], sizes = [1, 8, 8], strides = [1, 1, 1]} : vector<4x8x8xf32> to vector<1x8x8xf32>
    %80 = vector.shape_cast %79 : vector<1x8x8xf32> to vector<8x8xf32>
    %81 = vector.extract_strided_slice %76 {offsets = [2, 0, 0], sizes = [1, 8, 8], strides = [1, 1, 1]} : vector<4x8x8xf32> to vector<1x8x8xf32>
    %82 = vector.shape_cast %81 : vector<1x8x8xf32> to vector<8x8xf32>
    %83 = vector.extract_strided_slice %76 {offsets = [3, 0, 0], sizes = [1, 8, 8], strides = [1, 1, 1]} : vector<4x8x8xf32> to vector<1x8x8xf32>
    %84 = vector.shape_cast %83 : vector<1x8x8xf32> to vector<8x8xf32>
    %85 = tpu.concatenate %78, %80, %82, %84 in 1 : vector<8x8xf32>, vector<8x8xf32>, vector<8x8xf32>, vector<8x8xf32> -> vector<8x32xf32>
    %86 = arith.truncf %85 : vector<8x32xf32> to vector<8x32xbf16>
    %c0_19 = arith.constant 0 : index
    %c0_20 = arith.constant 0 : index
    %87 = vector.load %arg4[%c0_19, %c0_20] : memref<32x32xbf16, #tpu.memory_space<vmem>>, vector<32x32xbf16>
    %cst_21 = arith.constant dense<0.000000e+00> : vector<8x32xf32>
    %88 = tpu.matmul %86, %87, %cst_21 {dimension_numbers = #tpu.dot_dimension_numbers<[1], [0], [0], [1], [0, 0, 1, 1], [], []>} : vector<8x32xbf16>, vector<32x32xbf16>, vector<8x32xf32> -> vector<8x32xf32>
    %89 = arith.addf %2, %88 : vector<8x32xf32>
    %c0_22 = arith.constant 0 : index
    %c0_23 = arith.constant 0 : index
    %90 = vector.load %arg11[%c0_22, %c0_23] : memref<1x32xf32, #tpu.memory_space<vmem>>, vector<1x32xf32>
    %c0_24 = arith.constant 0 : index
    %c0_25 = arith.constant 0 : index
    %91 = vector.load %arg12[%c0_24, %c0_25] : memref<1x32xf32, #tpu.memory_space<vmem>>, vector<1x32xf32>
    %cst_26 = arith.constant dense<0.000000e+00> : vector<8xf32>
    %92 = vector.multi_reduction <add>, %89, %cst_26 [1] : vector<8x32xf32> to vector<8xf32>
    %93 = vector.shape_cast %92 : vector<8xf32> to vector<8x1xf32>
    %cst_27 = arith.constant 3.200000e+01 : f32
    %94 = vector.broadcast %cst_27 : f32 to vector<8x1xf32>
    %95 = arith.divf %93, %94 : vector<8x1xf32>
    %96 = vector.broadcast %95 : vector<8x1xf32> to vector<8x32xf32>
    %97 = arith.subf %89, %96 : vector<8x32xf32>
    %98 = arith.mulf %97, %97 : vector<8x32xf32>
    %cst_28 = arith.constant dense<0.000000e+00> : vector<8xf32>
    %99 = vector.multi_reduction <add>, %98, %cst_28 [1] : vector<8x32xf32> to vector<8xf32>
    %100 = vector.shape_cast %99 : vector<8xf32> to vector<8x1xf32>
    %cst_29 = arith.constant 0.0322580636 : f32
    %101 = vector.broadcast %cst_29 : f32 to vector<8x1xf32>
    %102 = arith.mulf %100, %101 : vector<8x1xf32>
    %103 = vector.broadcast %95 : vector<8x1xf32> to vector<8x32xf32>
    %104 = arith.subf %89, %103 : vector<8x32xf32>
    %105 = vector.broadcast %90 : vector<1x32xf32> to vector<8x32xf32>
    %106 = arith.mulf %105, %104 : vector<8x32xf32>
    %107 = math.sqrt %102 : vector<8x1xf32>
    %cst_30 = arith.constant 9.99999997E-7 : f32
    %108 = vector.broadcast %cst_30 : f32 to vector<8x1xf32>
    %109 = arith.addf %107, %108 : vector<8x1xf32>
    %110 = vector.broadcast %109 : vector<8x1xf32> to vector<8x32xf32>
    %111 = arith.divf %106, %110 : vector<8x32xf32>
    %112 = vector.broadcast %91 : vector<1x32xf32> to vector<8x32xf32>
    %113 = arith.addf %111, %112 : vector<8x32xf32>
    %114 = arith.truncf %113 : vector<8x32xf32> to vector<8x32xbf16>
    %c0_31 = arith.constant 0 : index
    %c0_32 = arith.constant 0 : index
    %115 = vector.load %arg5[%c0_31, %c0_32] : memref<32x64xbf16, #tpu.memory_space<vmem>>, vector<32x64xbf16>
    %cst_33 = arith.constant dense<0.000000e+00> : vector<8x64xf32>
    %116 = tpu.matmul %114, %115, %cst_33 {dimension_numbers = #tpu.dot_dimension_numbers<[1], [0], [0], [1], [0, 0, 1, 1], [], []>} : vector<8x32xbf16>, vector<32x64xbf16>, vector<8x64xf32> -> vector<8x64xf32>
    %c0_34 = arith.constant 0 : index
    %c0_35 = arith.constant 0 : index
    %117 = vector.load %arg6[%c0_34, %c0_35] : memref<1x64xf32, #tpu.memory_space<vmem>>, vector<1x64xf32>
    %118 = vector.broadcast %117 : vector<1x64xf32> to vector<8x64xf32>
    %119 = arith.addf %116, %118 : vector<8x64xf32>
    %cst_36 = arith.constant 0.000000e+00 : f32
    %120 = vector.broadcast %cst_36 : f32 to vector<8x64xf32>
    %121 = arith.maximumf %119, %120 : vector<8x64xf32>
    %122 = arith.truncf %121 : vector<8x64xf32> to vector<8x64xbf16>
    %c0_37 = arith.constant 0 : index
    %c0_38 = arith.constant 0 : index
    %123 = vector.load %arg7[%c0_37, %c0_38] : memref<64x32xbf16, #tpu.memory_space<vmem>>, vector<64x32xbf16>
    %cst_39 = arith.constant dense<0.000000e+00> : vector<8x32xf32>
    %124 = tpu.matmul %122, %123, %cst_39 {dimension_numbers = #tpu.dot_dimension_numbers<[1], [0], [0], [1], [0, 0, 1, 1], [], []>} : vector<8x64xbf16>, vector<64x32xbf16>, vector<8x32xf32> -> vector<8x32xf32>
    %c0_40 = arith.constant 0 : index
    %c0_41 = arith.constant 0 : index
    %125 = vector.load %arg8[%c0_40, %c0_41] : memref<1x32xf32, #tpu.memory_space<vmem>>, vector<1x32xf32>
    %126 = vector.broadcast %125 : vector<1x32xf32> to vector<8x32xf32>
    %127 = arith.addf %124, %126 : vector<8x32xf32>
    %128 = arith.addf %89, %127 : vector<8x32xf32>
    %c0_42 = arith.constant 0 : index
    %c0_43 = arith.constant 0 : index
    %c0_44 = arith.constant 0 : index
    %129 = vector.load %arg13[%c0_42, %c0_43, %c0_44] : memref<1x8x32xf32, #tpu.memory_space<vmem>>, vector<1x8x32xf32>
    %130 = vector.shape_cast %129 : vector<1x8x32xf32> to vector<8x32xf32>
    %131 = vector.shape_cast %128 : vector<8x32xf32> to vector<1x8x32xf32>
    tpu.vector_store %arg13[%c0_42, %c0_43, %c0_44], %131 {strides = array<i32>} : memref<1x8x32xf32, #tpu.memory_space<vmem>>, vector<1x8x32xf32>,
    return
  }
  func.func @transform_0(%arg0: i32) -> (i32, i32, i32) {
    %c0_i32 = arith.constant 0 : i32
    %c0_i32_0 = arith.constant 0 : i32
    %c0_i32_1 = arith.constant 0 : i32
    return %arg0, %c0_i32, %c0_i32_0 : i32, i32, i32
  }
  func.func @transform_1(%arg0: i32) -> (i32, i32) {
    %c0_i32 = arith.constant 0 : i32
    %c0_i32_0 = arith.constant 0 : i32
    %c0_i32_1 = arith.constant 0 : i32
    return %c0_i32, %c0_i32_0 : i32, i32
  }
  func.func @transform_2(%arg0: i32) -> (i32, i32) {
    %c0_i32 = arith.constant 0 : i32
    %c0_i32_0 = arith.constant 0 : i32
    %c0_i32_1 = arith.constant 0 : i32
    return %c0_i32, %c0_i32_0 : i32, i32
  }
  func.func @transform_3(%arg0: i32) -> (i32, i32) {
    %c0_i32 = arith.constant 0 : i32
    %c0_i32_0 = arith.constant 0 : i32
    %c0_i32_1 = arith.constant 0 : i32
    return %c0_i32, %c0_i32_0 : i32, i32
  }
  func.func @transform_4(%arg0: i32) -> (i32, i32) {
    %c0_i32 = arith.constant 0 : i32
    %c0_i32_0 = arith.constant 0 : i32
    %c0_i32_1 = arith.constant 0 : i32
    return %c0_i32, %c0_i32_0 : i32, i32
  }
  func.func @transform_5(%arg0: i32) -> (i32, i32) {
    %c0_i32 = arith.constant 0 : i32
    %c0_i32_0 = arith.constant 0 : i32
    %c0_i32_1 = arith.constant 0 : i32
    return %c0_i32, %c0_i32_0 : i32, i32
  }
  func.func @transform_6(%arg0: i32) -> (i32, i32) {
    %c0_i32 = arith.constant 0 : i32
    %c0_i32_0 = arith.constant 0 : i32
    %c0_i32_1 = arith.constant 0 : i32
    return %c0_i32, %c0_i32_0 : i32, i32
  }
  func.func @transform_7(%arg0: i32) -> (i32, i32) {
    %c0_i32 = arith.constant 0 : i32
    %c0_i32_0 = arith.constant 0 : i32
    %c0_i32_1 = arith.constant 0 : i32
    return %c0_i32, %c0_i32_0 : i32, i32
  }
  func.func @transform_8(%arg0: i32) -> (i32, i32) {
    %c0_i32 = arith.constant 0 : i32
    %c0_i32_0 = arith.constant 0 : i32
    %c0_i32_1 = arith.constant 0 : i32
    return %c0_i32, %c0_i32_0 : i32, i32
  }
  func.func @transform_9(%arg0: i32) -> (i32, i32) {
    %c0_i32 = arith.constant 0 : i32
    %c0_i32_0 = arith.constant 0 : i32
    %c0_i32_1 = arith.constant 0 : i32
    return %c0_i32, %c0_i32_0 : i32, i32
  }
  func.func @transform_10(%arg0: i32) -> (i32, i32) {
    %c0_i32 = arith.constant 0 : i32
    %c0_i32_0 = arith.constant 0 : i32
    %c0_i32_1 = arith.constant 0 : i32
    return %c0_i32, %c0_i32_0 : i32, i32
  }
  func.func @transform_11(%arg0: i32) -> (i32, i32) {
    %c0_i32 = arith.constant 0 : i32
    %c0_i32_0 = arith.constant 0 : i32
    %c0_i32_1 = arith.constant 0 : i32
    return %c0_i32, %c0_i32_0 : i32, i32
  }
  func.func @transform_12(%arg0: i32) -> (i32, i32, i32) {
    %c0_i32 = arith.constant 0 : i32
    %c0_i32_0 = arith.constant 0 : i32
    %c0_i32_1 = arith.constant 0 : i32
    return %arg0, %c0_i32, %c0_i32_0 : i32, i32, i32
  }
}

</mosaic_0001>

<bundles_post_ra>
// kernel: tpu_custom_call.1
= control target key start
LH: loop header
LB: loop body
LE: loop exit
PB: predicated region body
PF: predicated region fallthrough
CT: control target
= control target key end

     0   :  { %s1703_s0 = inlined_call_operand.hbm [shape: bf16[2,8,32], index: 0, kind: input, shape index: {}]   ;;  %s1704_s1 = inlined_call_operand.hbm [shape: f32[8,8], index: 1, kind: input, shape index: {}]   ;;  %s1705_s2 = inlined_call_operand.vmem [shape: bf16[32,96], index: 2, kind: input, shape index: {}]   ;;  %s1706_s3 = inlined_call_operand.vmem [shape: bf16[32,32], index: 3, kind: input, shape index: {}]   ;;  %s1707_s4 = inlined_call_operand.vmem [shape: bf16[32,64], index: 4, kind: input, shape index: {}]   ;;  %s1708_s5 = inlined_call_operand.vmem [shape: f32[1,64], index: 5, kind: input, shape index: {}]   ;;  %s1709_s6 = inlined_call_operand.vmem [shape: bf16[64,32], index: 6, kind: input, shape index: {}]   ;;  %s1710_s7 = inlined_call_operand.vmem [shape: f32[1,32], index: 7, kind: input, shape index: {}]   ;;  %s1711_s8 = inlined_call_operand.vmem [shape: f32[1,32], index: 8, kind: input, shape index: {}]   ;;  %s1712_s9 = inlined_call_operand.vmem [shape: f32[1,32], index: 9, kind: input, shape index: {}]   ;;  %s1713_s10 = inlined_call_operand.vmem [shape: f32[1,32], index: 10, kind: input, shape index: {}]   ;;  %s1714_s11 = inlined_call_operand.vmem [shape: f32[1,32], index: 11, kind: input, shape index: {}]   ;;  %s1715_s12 = inlined_call_operand.hbm [shape: f32[2,8,32], index: 12, kind: output, shape index: {}]  }
   0x1   :  { %1721 = sst [smem:[#allocation16_spill]] %s1704_s1 }
   0x2   :  { %17 = vsyncpa [#allocation3], 0 }
   0x3   :  { %19 = vsyncpa [#allocation3 + $0x1], 0 }
   0x4   :  { %20 = vsyncpa [#allocation6], 0 }
   0x5   :  { %21 = vsyncpa [#allocation4], 0 }
   0x6   :  { %23 = vsyncpa [#allocation4 + $0x1], 0  ;;  %s1453_s21 = smov 0   ;;  %s1455_s22 = smov 0  }
   0x7   :  { %s1457_s23 = smov 0   ;;  %s1459_s24 = smov 0  }
   0x8 LB: > { %1722 = sst [smem:[#allocation11_spill]] %s1364_s21  ;;  %s1474_s25 = sadd.s32 4294967295, %s1376_s24   ;;  %s1376_s24 = sphi %s1459_s24, %s1736_s24   ;;  %s1372_s23 = sphi %s1457_s23, %s1738_s23   ;;  %s1368_s22 = sphi %s1455_s22, %s1740_s22   ;;  %s1364_s21 = sphi %s1453_s21, %s1739_s21  }
   0x9   : > { %1723 = sst [smem:[#allocation12_spill]] %s1372_s23  ;;  %s1072_s26 = sadd.s32 4294967294, %s1376_s24  }
   0xa   : > { %p49_p0 = scmp.ne.s32.totalorder %s1368_s22, %s1364_s21  ;;  %p50_p1 = scmp.eq.s32.totalorder %s1474_s25, 0 }
   0xb   : > { %p304_p2 = scmp.eq.s32.totalorder %s1474_s25, 1  ;;  %p310_p3 = scmp.eq.s32.totalorder %s1072_s26, 1 }
   0xc   : > { %p1483_p4 = por %p50_p1, %p49_p0  ;;  %p1073_p5 = scmp.ge.s32.totalorder %s1376_s24, 1 }
   0xd   : > { %p1488_p6 = por %p310_p3, %p49_p0  ;;  %p317_p7 = scmp.lt.s32.totalorder %s1376_s24, 3 }
   0xe   : > { %s1727_s1 = sld [smem:[#allocation16_spill]]  ;;  %s1378_s15 = smov [#allocation5]  }
   0xf   : > { %s1725_s28 = scalar_select %p1488_p6, 1, 0 }
  0x10   : > { %p1496_p8 = pnand %p1073_p5, %p317_p7  ;;  %s331_s16 = sshll.u32 %s1378_s15, 4  ;;  %s332_s16 = int_to_ptr.vmem [resolvable:$true] %s331_s16 }
  0x11   : > { %1726 = sst [smem:[#allocation13_spill]] %s1725_s28  ;;  %s1506_s17 = sadd.s32 1, %s1376_s24  }
  0x12   : > { %p1156_p10 = pneg %p1496_p8  ;;  %1729 = sst [smem:[#allocation14_spill]] %s1506_s17 }
  0x13   : > { %s36_s18 = sadd.s32 1, %s1372_s23  ;;  %s33_s19 = ssub.s32 %s1376_s24, %s1506_s17 }
  0x14   : > { %s329_s13 = sshll.u32 %s1727_s1, 4  ;;  %p1157_p11 = pnand %p1156_p10, %p50_p1  ;;  %s330_s13 = int_to_ptr.hbm [resolvable:$true] %s329_s13 }
  0x15   : > { %p34_p12 = scmp.eq.s32.totalorder %s33_s19, 0  ;;  %p43_p13 = scmp.ne.s32.totalorder %s1372_s23, %s1368_s22 }
  0x16   : > { %1159 = dma.hbm_to_vmem [thread:$0]  (!%p1157_p11), %s330_s13, 128, %s332_s16, [#allocation6]  }
  0x17   : > { %p44_p0 = scmp.eq.s32.totalorder %s1376_s24, 0  ;;  %p1519_p3 = por %p304_p2, %p43_p13 }
  0x18   : > { %s1515_s20 = scalar_select %p34_p12, %s1372_s23, %s36_s18  }
  0x19   : > { %p1169_p5 = scmp.lt.s32.totalorder %s1376_s24, 2  ;;  %s372_s29 = sand.u32 1, %s1372_s23  }
  0x1a   : > { %1730 = sst [smem:[#allocation15_spill]] %s1515_s20  ;;  %s1077_s30 = sshll.u32 %s1376_s24, 2 }
  0x1b   : > { %p45_p7 = por %p44_p0, %p43_p13  ;;  %s1076_s15 = sshll.u32 %s372_s29, 2 }
  0x1c   : > { %s380_s17 = scalar_lea.hbm %s1703_s0, %s1077_s30  ;;  %s376_s16 = scalar_lea.vmem [#allocation2], %s1076_s15 }
  0x1d   : > { %s382_s13 = sshll.u32 %s380_s17, 4  ;;  %s384_s19 = sshll.u32 %s376_s16, 4  ;;  %s383_s13 = int_to_ptr.hbm [resolvable:$true] %s382_s13  ;;  %s385_s19 = int_to_ptr.vmem [resolvable:$true] %s384_s19 }
  0x1e   : > { %p1529_p10 = pnand %p1169_p5, %p45_p7  ;;  %s373_s20 = scalar_lea.sflag [#allocation3], %s372_s29 }
  0x1f   : > { %s1276_s21 = sshra.s32 %s383_s13, 4  ;;  %s1283_s17 = scalar_lea.hbm %s1703_s0, 8  ;;  %s1277_s21 = int_to_ptr.hbm [resolvable:$true] %s1276_s21 }
  0x20   : > { %s1278_s23 = scalar_lea.hbm %s1277_s21, 4  ;;  %p1280_p11 = pneg %p1529_p10 }
  0x21   : > { %p1279_p2 = scmp.ne.s32.totalorder %s1277_s21, %s1278_s23  ;;  %p1284_p0 = scmp.lt.s32.totalorder %s1277_s21, %s1703_s0 }
  0x22   : > { %p1285_p5 = scmp.lt.s32.totalorder %s1283_s17, %s1278_s23 }
  0x23   : > { %p1281_p12 = pnand %p1280_p11, %p1279_p2 }
  0x24   : > { %p1286_p7 = por %p1285_p5, %p1284_p0 }
  0x25   : > { %p1282_p13 = pneg %p1281_p12 }
  0x27   : > { %p1287_p9 = pnand %p1286_p7, %p1282_p13 }
  0x29   : > { %1290 = shalt.err (!%p1287_p9)
}
  0x2a   : > { %1163 = dma.hbm_to_vmem [thread:$0]  (!%p1529_p10), %s383_s13, 64, %s385_s19, %s373_s20  }
  0x2b   : > { %393 = sbr.rel (%p1496_p8) target bundleno = 2035 (0x7f3), region = 68  ;;  %s1546_s29 = sand.u32 (!%p1496_p8), 1, %s1368_s22  }
  0x2c   : > { %s1079_s16 = sshll.u32 (!%p1496_p8), %s1546_s29, 2  ;;  %s396_s1 = scalar_lea.sflag (!%p1496_p8), [#allocation3], %s1546_s29 }
  0x2d   : > { %s399_s28 = scalar_lea.vmem (!%p1496_p8), [#allocation2], %s1079_s16 }
  0x30   : > { %1351 = dma.done.wait (%p1483_p4), %s396_s1, 64  }
  0x31   : > { %1353 = vsyncadd (%p1483_p4), %s396_s1, 4294967232 }
  0x32   : > { %1355 = dma.done.wait (%p50_p1), [#allocation6], 128  }
  0x33   : > { %1357 = vsyncadd (%p50_p1), [#allocation6], 4294967168  ;;  %v447_v0 = vld [vmem:[%s399_s28] sm:$0xf]  ;;  %vm451_vm0 = vcmask 261120   ;;  %v1379_v3 = vmov 32.0  }
  0x34   : > { %v1558_v1 = vunpack.c.l.bf16 %v447_v0  ;;  %1220 = vrcp.f32 %v1379_v3  ;;  %v1139_v15 = vld [vmem:[%s1705_s2 + $0x8] sm:$0xff]  ;;  %v1138_v16 = vld [vmem:[%s1705_s2] sm:$0xff]  ;;  %s1380_s17 = smov 104   ;;  %s1381_s30 = smov 120   ;;  %vm558_vm8 = vcmask 64512   ;;  %vm703_vm9 = vcmask 1043456  }
  0x35   : > { %531 = vmatpush.bf16.msra.mxu0 %v1139_v15  ;;  %v1214_v34 = vld [vmem:[%s1711_s8] ss:$0 sm:$0xff]  ;;  %s1382_s15 = smov 112   ;;  %s1383_s16 = smov 96   ;;  %vm796_vm10 = vcmask 130048   ;;  %vm798_vm11 = vcmask 195584  }
  0x36   : > { %v452_v2 = vsel %vm451_vm0, %v1558_v1, 0.0  ;;  %v1215_v41 = vld [vmem:[%s1712_s9] ss:$0 sm:$0xff]  ;;  %s1384_s1 = smov 64   ;;  %s1385_s28 = smov 8  }
  0x37   : > { %453 = vadd.xlane.f32.xlu0 %v452_v2  ;;  %s1386_s21 = smov 24   ;;  %s1387_s23 = smov 16  }
  0x39   : > { %532 = vmatpush.bf16.msra.mxu0 %v1138_v16 }
  0x3a   : > { %v1221_v4 = vpop.eup %1220 }
  0x3b   : > { %v456_v5 = vmul.f32 32.0, %v1221_v4  ;;  %vm460_vm1 = vweird.f32 %v1221_v4 }
  0x3d   : > { %v457_v6 = vsub.f32 1.0, %v456_v5 }
  0x3f   : > { %v458_v7 = vmul.f32 %v1221_v4, %v457_v6 }
  0x41   : > { %v459_v8 = vadd.f32 %v1221_v4, %v458_v7 }
  0x43   : > { %v1562_v9 = vsel %vm460_vm1, %v1221_v4, %v459_v8  ;;  %v552_v8 = vld [vmem:[#allocation5] sm:$0xff] }
  0xaa   : > { %v454_v10 = vpop.xlane.xlu0 %453 }
  0xab   : > { %v462_v11 = vmul.f32 %v1562_v9, %v454_v10 }
  0xad   : > { %v463_v12 = vsub.f32 %v1558_v1, %v462_v11 }
  0xaf   : > { %v464_v13 = vmul.f32 %v463_v12, %v463_v12  ;;  %v472_v39 = vmul.f32 %v1214_v34, %v463_v12 }
  0xb1   : > { %v465_v14 = vsel %vm451_vm0, %v464_v13, 0.0 }
  0xb2   : > { %466 = vadd.xlane.f32.xlu0 %v465_v14 }
 0x125   : > { %v467_v17 = vpop.xlane.xlu0 %466 }
 0x126   : > { %v468_v18 = vmul.f32 0.032258064, %v467_v17 }
 0x128   : > { %1222 = vrsqrt.f32 %v468_v18  ;;  %vm480_vm2 = vcmp.eq.f32.partialorder %v468_v18, inf  ;;  %v483_v26 = vand.u32 2147483648, %v468_v18  ;;  %vm482_vm3 = vcmp.eq.f32.partialorder %v468_v18, 0.0 }
 0x12e   : > { %v1223_v19 = vpop.eup %1222 }
 0x12f   : > { %v474_v20 = vmul.f32 %v1223_v19, %v468_v18 }
 0x131   : > { %v475_v21 = vmul.f32 %v1223_v19, %v474_v20 }
 0x133   : > { %v476_v22 = vmul.f32 0.5, %v475_v21 }
 0x135   : > { %v477_v23 = vsub.f32 1.5, %v476_v22 }
 0x137   : > { %v478_v24 = vmul.f32 %v1223_v19, %v477_v23 }
 0x139   : > { %v479_v25 = vmul.f32 %v478_v24, %v468_v18 }
 0x13b   : > { %v481_v27 = vsel %vm480_vm2, %v468_v18, %v479_v25 }
 0x13c   : > { %v484_v28 = vsel %vm482_vm3, %v483_v26, %v481_v27  ;;  %vm957_vm3 = vcmask 523264  }
 0x13d   : > { %v485_v29 = vadd.f32 1e-06, %v484_v28 }
 0x13f   : > { %1224 = vrcp.f32 %v485_v29  ;;  %v497_v33 = vand.u32 2147483648, %v485_v29  ;;  %v495_v36 = vand.u32 2147483647, %v485_v29  ;;  %vm491_vm5 = vweird.f32 %v485_v29 }
 0x141   : > { %v498_v38 = vor.u32 1.1754944e-38, %v497_v33  ;;  %vm496_vm7 = vcmp.eq.f32.partialorder %v495_v36, 8.507059e+37 }
 0x145   : > { %v1225_v30 = vpop.eup %1224 }
 0x146   : > { %v487_v31 = vmul.f32 %v1225_v30, %v485_v29  ;;  %vm492_vm4 = vweird.f32 %v1225_v30 }
 0x147   : > { %vm493_vm6 = vmor %vm491_vm5, %vm492_vm4 }
 0x148   : > { %v488_v32 = vsub.f32 1.0, %v487_v31 }
 0x14a   : > { %v489_v35 = vmul.f32 %v1225_v30, %v488_v32 }
 0x14c   : > { %v490_v37 = vadd.f32 %v1225_v30, %v489_v35 }
 0x14e   : > { %v494_v40 = vsel %vm493_vm6, %v1225_v30, %v490_v37 }
 0x14f   : > { %v499_v42 = vsel %vm496_vm7, %v498_v38, %v494_v40 }
 0x150   : > { %v500_v43 = vmul.f32 %v499_v42, %v472_v39 }
 0x152   : > { %v504_v44 = vadd.f32 %v1215_v41, %v500_v43 }
 0x154   : > { %v505_v45 = vpack.c.bf16 %v504_v44, %v504_v44 }
 0x156   : > { %1090 = vmatmul.msk.bf16.vlgmr.msra.gmra.mxu0 %vm451_vm0, %v505_v45 }
 0x1d3   : > { %v534_v46 = vpop.f32.mrf.mxu0 }
 0x1d4   : > { %545 = vrot.lane.b32.xlu2 %v534_v46, %s1380_s17  ;;  %539 = vrot.lane.b32.xlu1 %v534_v46, %s1381_s30  ;;  %v548_v55 = vpack.c.bf16 %v534_v46, %v534_v46 }
 0x1d6   : > { %v554_v59 = vunpack.c.l.b16 %v548_v55 }
 0x1d8   : > { %v1585_v62 = vpack.c.b16 %v554_v59, %v554_v59 }
 0x1db   : > { %v536_v47 = vpop.f32.mrf.mxu0 }
 0x1dc   : > { %542 = vrot.lane.b32.xlu1 %v534_v46, %s1382_s15  ;;  %s1081_s15 = sshll.u32 %s1546_s29, 3 }
 0x1dd   : > { %s445_s14 = scalar_lea.vmem [#allocation7], %s1081_s15  ;;  %s1326_s15 = scalar_lea.hbm %s1715_s12, 16 }
 0x1de   : > { %s989_s20 = sshll.u32 %s445_s14, 4  ;;  %s990_s20 = int_to_ptr.vmem [resolvable:$true] %s989_s20 }
 0x22e   : > { %v546_v48 = vpop.permute.xlu2 %545 }
 0x22f   : > { %v551_v49 = vpack.c.bf16 %v546_v48, %v546_v48 }
 0x231   : > { %v627_v50 = vunpack.c.l.b16 %v551_v49 }
 0x233   : > { %v1580_v51 = vpack.c.b16 %v627_v50, %v627_v50 }
 0x235   : > { %629 = vrot.lane.b32.xlu1 %v1580_v51, %s1383_s16 }
 0x246   : > { %v540_v52 = vpop.permute.xlu1 %539 }
 0x247   : > { %v549_v53 = vpack.c.bf16 %v540_v52, %v540_v52 }
 0x249   : > { %v579_v54 = vunpack.c.l.b16 %v549_v53 }
 0x24b   : > { %v580_v56 = vpack.c.b16 %v579_v54, %v579_v54 }
 0x24d   : > { %581 = vrot.lane.b32.xlu2 %v580_v56, %s1383_s16 }
 0x24e   : > { %v543_v57 = vpop.permute.xlu1 %542 }
 0x24f   : > { %v550_v58 = vpack.c.bf16 %v543_v57, %v543_v57 }
 0x251   : > { %v603_v60 = vunpack.c.l.b16 %v550_v58 }
 0x253   : > { %v1583_v61 = vpack.c.b16 %v603_v60, %v603_v60 }
 0x255   : > { %605 = vrot.lane.b32.xlu0 %v1583_v61, %s1383_s16  ;;  %556 = vrot.lane.b32.xlu2 %v1585_v62, %s1383_s16  ;;  %s1135_s16 = sshll.u32 %s1474_s25, 3  ;;  %s977_s25 = scalar_lea.sflag [#allocation4], %s1546_s29 }
 0x256   : > { %s987_s27 = scalar_lea.hbm %s1715_s12, %s1135_s16 }
 0x257   : > { %s991_s13 = sshll.u32 %s987_s27, 4  ;;  %s992_s13 = int_to_ptr.hbm [resolvable:$true] %s991_s13 }
 0x258   : > { %s1320_s19 = sshra.s32 %s992_s13, 4  ;;  %s1321_s19 = int_to_ptr.hbm [resolvable:$true] %s1320_s19 }
 0x259   : > { %s1322_s18 = scalar_lea.hbm %s1321_s19, 8  ;;  %p1327_p9 = scmp.lt.s32.totalorder %s1321_s19, %s1715_s12 }
 0x25a   : > { %p1323_p1 = scmp.ne.s32.totalorder %s1321_s19, %s1322_s18  ;;  %p1328_p10 = scmp.lt.s32.totalorder %s1326_s15, %s1322_s18 }
 0x25c   : > { %p1324_p4 = pnand %p1323_p1, %p1519_p3  ;;  %p1329_p2 = por %p1328_p10, %p1327_p9 }
 0x25e   : > { %p1325_p8 = pneg %p1324_p4 }
 0x260   : > { %p1330_p11 = pnand %p1329_p2, %p1325_p8 }
 0x2a7   : > { %v582_v63 = vpop.permute.xlu2 %581  ;;  %v630_v0 = vpop.permute.xlu1 %629 }
 0x2a8   : > { %v587_v2 = vsel %vm558_vm8, %v582_v63, 0  ;;  %v635_v3 = vsel %vm558_vm8, %v630_v0, 0 }
 0x2a9   : > { %596 = vmatpush.bf16.xpose.msra.mxu2 %v587_v2  ;;  %644 = vmatpush.bf16.xpose.msrb.mxu0 %v635_v3 }
 0x2af   : > { %v557_v4 = vpop.permute.xlu2 %556 }
 0x2b0   : > { %1092 = vmatmul.msk.bf16.vlgmr.msra.gmra.mxu2 %vm558_vm8, %v549_v53  ;;  %1094 = vmatmul.msk.bf16.vlgmr.msrb.gmra.mxu0 %vm558_vm8, %v551_v49  ;;  %v563_v5 = vsel %vm558_vm8, %v557_v4, 0 }
 0x2b1   : > { %572 = vmatpush.bf16.xpose.msra.mxu1 %v563_v5 }
 0x2b8   : > { %1091 = vmatmul.msk.bf16.vlgmr.msra.gmra.mxu1 %vm558_vm8, %v548_v55 }
 0x2c7   : > { %v606_v6 = vpop.permute.xlu0 %605 }
 0x2c8   : > { %v611_v7 = vsel %vm558_vm8, %v606_v6, 0 }
 0x2c9   : > { %620 = vmatpush.bf16.xpose.msra.mxu3 %v611_v7 }
 0x2d0   : > { %1093 = vmatmul.msk.bf16.vlgmr.msra.gmra.mxu3 %vm558_vm8, %v550_v58 }
 0x32d   : > { %v646_v10 = vpop.f32.mrf.mxu0 }
 0x32e   : > { %v647_v11 = vadd.f32 %v646_v10, %v552_v8 }
 0x330   : > { %v659_v12 = vsel %vm558_vm8, %v647_v11, -inf }
 0x331   : > { %660 = vmax.xlane.f32.xlu0 %v659_v12 }
 0x333   : > { %v598_v13 = vpop.f32.mrf.mxu2 }
 0x334   : > { %v599_v14 = vadd.f32 %v598_v13, %v552_v8 }
 0x335   : > { %v574_v15 = vpop.f32.mrf.mxu1  ;;  %v648_v16 = vpop.f32.mrf.mxu0 }
 0x336   : > { %v653_v17 = vsel %vm558_vm8, %v599_v14, -inf  ;;  %v575_v23 = vadd.f32 %v574_v15, %v552_v8  ;;  %v1141_v16 = vld [vmem:[%s1706_s3 + $0x8] sm:$0xff] }
 0x337   : > { %654 = vmax.xlane.f32.xlu1 %v653_v17  ;;  %v1140_v17 = vld [vmem:[%s1706_s3] sm:$0xff] }
 0x338   : > { %v650_v25 = vsel %vm558_vm8, %v575_v23, -inf }
 0x33b   : > { %v600_v18 = vpop.f32.mrf.mxu2 }
 0x33d   : > { %v576_v19 = vpop.f32.mrf.mxu1 }
 0x345   : > { %720 = vrot.lane.b32.xlu0 %v580_v56, %s1384_s1 }
 0x353   : > { %v622_v20 = vpop.f32.mrf.mxu3 }
 0x354   : > { %v623_v21 = vadd.f32 %v622_v20, %v552_v8 }
 0x356   : > { %v656_v22 = vsel %vm558_vm8, %v623_v21, -inf }
 0x357   : > { %657 = vmax.xlane.f32.xlu2 %v656_v22 }
 0x35b   : > { %v624_v24 = vpop.f32.mrf.mxu3 }
 0x35f   : > { %651 = vmax.xlane.f32.xlu2 %v650_v25 }
 0x3a4   : > { %v661_v26 = vpop.xlane.xlu0 %660 }
 0x3a5   : > { %v665_v27 = vsub.f32 %v647_v11, %v661_v26 }
 0x3a7   : > { %v672_v28 = vmul.f32 1.442695, %v665_v27 }
 0x3a9   : > { %1226 = vpow2.f32 %v672_v28 }
 0x3aa   : > { %v655_v29 = vpop.xlane.xlu1 %654 }
 0x3ab   : > { %v663_v30 = vsub.f32 %v599_v14, %v655_v29 }
 0x3ad   : > { %v668_v31 = vmul.f32 1.442695, %v663_v30 }
 0x3af   : > { %v1227_v32 = vpop.eup %1226  ;;  %1228 = vpow2.f32 %v668_v31 }
 0x3b0   : > { %v683_v33 = vsel %vm558_vm8, %v1227_v32, 0.0 }
 0x3b1   : > { %684 = vadd.xlane.f32.xlu1 %v683_v33 }
 0x3b5   : > { %v1229_v34 = vpop.eup %1228 }
 0x3b6   : > { %v677_v36 = vsel %vm558_vm8, %v1229_v34, 0.0 }
 0x3b7   : > { %v721_v35 = vpop.permute.xlu0 %720 }
 0x3b8   : > { %v726_v37 = vsel %vm703_vm9, %v721_v35, 0 }
 0x3b9   : > { %678 = vadd.xlane.f32.xlu1 %v677_v36  ;;  %735 = vmatpush.bf16.msrb.mxu2 %v726_v37 }
 0x3ca   : > { %v658_v38 = vpop.xlane.xlu2 %657 }
 0x3cb   : > { %v664_v39 = vsub.f32 %v623_v21, %v658_v38 }
 0x3cd   : > { %v670_v40 = vmul.f32 1.442695, %v664_v39 }
 0x3cf   : > { %1230 = vpow2.f32 %v670_v40 }
 0x3d2   : > { %v652_v41 = vpop.xlane.xlu2 %651  ;;  %762 = vrot.lane.b32.xlu1 %v1580_v51, %s1384_s1 }
 0x3d3   : > { %v662_v42 = vsub.f32 %v575_v23, %v652_v41  ;;  %v1147_v41 = vld [vmem:[%s1709_s6 + $0x18] sm:$0xff] }
 0x3d5   : > { %v1231_v43 = vpop.eup %1230  ;;  %v666_v44 = vmul.f32 1.442695, %v662_v42 }
 0x3d6   : > { %v680_v45 = vsel %vm558_vm8, %v1231_v43, 0.0 }
 0x3d7   : > { %1232 = vpow2.f32 %v666_v44  ;;  %681 = vadd.xlane.f32.xlu2 %v680_v45 }
 0x3dd   : > { %v1233_v46 = vpop.eup %1232 }
 0x3de   : > { %v674_v47 = vsel %vm558_vm8, %v1233_v46, 0.0 }
 0x3df   : > { %675 = vadd.xlane.f32.xlu0 %v674_v47 }
 0x3ef   : > { %741 = vrot.lane.b32.xlu2 %v1583_v61, %s1384_s1 }
 0x3f7   : > { %698 = vrot.lane.b32.xlu2 %v1585_v62, %s1384_s1 }
 0x424   : > { %v685_v48 = vpop.xlane.xlu1 %684 }
 0x42c   : > { %v679_v49 = vpop.xlane.xlu1 %678 }
 0x42d   : > { %1234 = vrcp.f32 %v679_v49 }
 0x42e   : > { %1236 = vrcp.f32 %v685_v48 }
 0x433   : > { %v1235_v50 = vpop.eup %1234 }
 0x434   : > { %v691_v51 = vmul.f32 %v1235_v50, %v1229_v34  ;;  %v1237_v53 = vpop.eup %1236  ;;  %v1143_v34 = vld [vmem:[%s1707_s4 + $0x8] sm:$0xff] }
 0x435   : > { %v693_v54 = vmul.f32 %v1237_v53, %v1227_v32  ;;  %912 = vmatpush.bf16.msra.mxu2 %v1143_v34  ;;  %v1216_v53 = vld [vmem:[%s1713_s10] ss:$0 sm:$0xff] }
 0x436   : > { %v695_v52 = vpack.c.bf16 %v691_v51, %v691_v51 }
 0x437   : > { %v697_v57 = vpack.c.bf16 %v693_v54, %v693_v54 }
 0x438   : > { %1096 = vmatmul.msk.bf16.vlgmr.msrb.gmra.mxu2 %vm558_vm8, %v695_v52 }
 0x444   : > { %v763_v55 = vpop.permute.xlu1 %762 }
 0x445   : > { %v768_v56 = vsel %vm703_vm9, %v763_v55, 0 }
 0x446   : > { %777 = vmatpush.bf16.msra.mxu0 %v768_v56 }
 0x449   : > { %1098 = vmatmul.msk.bf16.vlgmr.msra.gmra.mxu0 %vm558_vm8, %v697_v57 }
 0x44a   : > { %v682_v58 = vpop.xlane.xlu2 %681 }
 0x44b   : > { %1238 = vrcp.f32 %v682_v58 }
 0x451   : > { %v1239_v59 = vpop.eup %1238 }
 0x452   : > { %v692_v60 = vmul.f32 %v1239_v59, %v1231_v43  ;;  %v742_v61 = vpop.permute.xlu2 %741  ;;  %v676_v62 = vpop.xlane.xlu0 %675  ;;  %v1146_v43 = vld [vmem:[%s1709_s6 + $0x10] sm:$0xff] }
 0x453   : > { %1240 = vrcp.f32 %v676_v62  ;;  %v747_v63 = vsel %vm703_vm9, %v742_v61, 0 }
 0x454   : > { %756 = vmatpush.bf16.msrb.mxu3 %v747_v63  ;;  %v696_v0 = vpack.c.bf16 %v692_v60, %v692_v60  ;;  %v1217_v60 = vld [vmem:[%s1714_s11] ss:$0 sm:$0xff] }
 0x457   : > { %1097 = vmatmul.msk.bf16.vlgmr.msrb.gmra.mxu3 %vm558_vm8, %v696_v0 }
 0x458   : > { %965 = vmatpush.bf16.msra.mxu3 %v1147_v41 }
 0x459   : > { %v1241_v2 = vpop.eup %1240 }
 0x45a   : > { %v690_v3 = vmul.f32 %v1241_v2, %v1233_v46  ;;  %v699_v4 = vpop.permute.xlu2 %698  ;;  %v1145_v2 = vld [vmem:[%s1709_s6 + $0x8] sm:$0xff] }
 0x45b   : > { %v705_v5 = vsel %vm703_vm9, %v699_v4, 0  ;;  %v1218_v4 = vld [vmem:[%s1708_s5] ss:$0 sm:$0xff] }
 0x45c   : > { %v694_v6 = vpack.c.bf16 %v690_v3, %v690_v3  ;;  %714 = vmatpush.bf16.msrb.mxu1 %v705_v5  ;;  %966 = vmatpush.bf16.msra.mxu3 %v1146_v43  ;;  %v1144_v3 = vld [vmem:[%s1709_s6] sm:$0xff] }
 0x45f   : > { %1095 = vmatmul.msk.bf16.vlgmr.msrb.gmra.mxu1 %vm558_vm8, %v694_v6 }
 0x460   : > { %826 = vmatpush.bf16.msra.mxu1 %v1141_v16  ;;  %967 = vmatpush.bf16.msra.mxu3 %v1145_v2 }
 0x464   : > { %827 = vmatpush.bf16.msra.mxu1 %v1140_v17  ;;  %968 = vmatpush.bf16.msra.mxu3 %v1144_v3 }
 0x4bb   : > { %v737_v7 = vpop.f32.mrf.mxu2 }
 0x4bc   : > { %784 = vrot.lane.b32.xlu1 %v737_v7, %s1385_s28 }
 0x4c3   : > { %v739_v8 = vpop.f32.mrf.mxu2 }
 0x4c6   : > { %v779_v10 = vpop.f32.mrf.mxu0 }
 0x4c7   : > { %792 = vrot.lane.b32.xlu1 %v779_v10, %s1386_s21 }
 0x4ce   : > { %v781_v11 = vpop.f32.mrf.mxu0 }
 0x4cf   : > { %v1219_v11 = vld [vmem:[%s1710_s7] ss:$0 sm:$0xff] }
 0x4da   : > { %v758_v12 = vpop.f32.mrf.mxu3 }
 0x4db   : > { %788 = vrot.lane.b32.xlu2 %v758_v12, %s1387_s23 }
 0x4dc   : > { %v716_v13 = vpop.f32.mrf.mxu1 }
 0x4e2   : > { %v760_v14 = vpop.f32.mrf.mxu3 }
 0x4e4   : > { %v718_v15 = vpop.f32.mrf.mxu1 }
 0x52e   : > { %v785_v18 = vpop.permute.xlu1 %784 }
 0x52f   : > { %v795_v20 = vsel %vm558_vm8, %v716_v13, %v785_v18 }
 0x535   : > { %v789_v19 = vpop.permute.xlu2 %788 }
 0x536   : > { %v797_v21 = vsel %vm796_vm10, %v795_v20, %v789_v19 }
 0x539   : > { %v793_v22 = vpop.permute.xlu1 %792 }
 0x53a   : > { %v799_v23 = vsel %vm798_vm11, %v797_v21, %v793_v22 }
 0x53b   : > { %v800_v24 = vpack.c.bf16 %v799_v23, %v799_v23 }
 0x53d   : > { %1107 = vmatmul.msk.bf16.vlgmr.msra.gmra.mxu1 %vm451_vm0, %v800_v24 }
 0x5ba   : > { %v829_v25 = vpop.f32.mrf.mxu1 }
 0x5bb   : > { %v1629_v26 = vadd.f32 %v829_v25, %v1558_v1  ;;  %v1142_v1 = vld [vmem:[%s1707_s4] sm:$0xff] }
 0x5bc   : > { %913 = vmatpush.bf16.msra.mxu2 %v1142_v1 }
 0x5bd   : > { %v836_v27 = vsel %vm451_vm0, %v1629_v26, 0.0 }
 0x5be   : > { %837 = vadd.xlane.f32.xlu2 %v836_v27 }
 0x5c2   : > { %v831_v28 = vpop.f32.mrf.mxu1 }
 0x631   : > { %v838_v29 = vpop.xlane.xlu2 %837 }
 0x632   : > { %v839_v30 = vmul.f32 %v838_v29, %v1562_v9 }
 0x634   : > { %v840_v31 = vsub.f32 %v1629_v26, %v839_v30 }
 0x636   : > { %v841_v32 = vmul.f32 %v840_v31, %v840_v31  ;;  %v849_v58 = vmul.f32 %v1216_v53, %v840_v31 }
 0x638   : > { %v842_v33 = vsel %vm451_vm0, %v841_v32, 0.0 }
 0x639   : > { %843 = vadd.xlane.f32.xlu1 %v842_v33 }
 0x6ac   : > { %v844_v35 = vpop.xlane.xlu1 %843 }
 0x6ad   : > { %v845_v36 = vmul.f32 0.032258064, %v844_v35 }
 0x6af   : > { %1242 = vrsqrt.f32 %v845_v36  ;;  %vm857_vm12 = vcmp.eq.f32.partialorder %v845_v36, inf  ;;  %v860_v45 = vand.u32 2147483648, %v845_v36  ;;  %vm859_vm13 = vcmp.eq.f32.partialorder %v845_v36, 0.0 }
 0x6b5   : > { %v1243_v9 = vpop.eup %1242 }
 0x6b6   : > { %v851_v37 = vmul.f32 %v1243_v9, %v845_v36 }
 0x6b8   : > { %v852_v38 = vmul.f32 %v1243_v9, %v851_v37 }
 0x6ba   : > { %v853_v39 = vmul.f32 0.5, %v852_v38 }
 0x6bc   : > { %v854_v40 = vsub.f32 1.5, %v853_v39 }
 0x6be   : > { %v855_v42 = vmul.f32 %v1243_v9, %v854_v40 }
 0x6c0   : > { %v856_v44 = vmul.f32 %v855_v42, %v845_v36 }
 0x6c2   : > { %v858_v46 = vsel %vm857_vm12, %v845_v36, %v856_v44 }
 0x6c3   : > { %v861_v47 = vsel %vm859_vm13, %v860_v45, %v858_v46 }
 0x6c4   : > { %v862_v48 = vadd.f32 1e-06, %v861_v47 }
 0x6c6   : > { %1244 = vrcp.f32 %v862_v48  ;;  %v874_v52 = vand.u32 2147483648, %v862_v48  ;;  %v872_v55 = vand.u32 2147483647, %v862_v48  ;;  %vm868_vm15 = vweird.f32 %v862_v48 }
 0x6c8   : > { %v875_v57 = vor.u32 1.1754944e-38, %v874_v52  ;;  %vm873_vm2 = vcmp.eq.f32.partialorder %v872_v55, 8.507059e+37 }
 0x6cc   : > { %v1245_v49 = vpop.eup %1244 }
 0x6cd   : > { %v864_v50 = vmul.f32 %v1245_v49, %v862_v48  ;;  %vm869_vm14 = vweird.f32 %v1245_v49 }
 0x6ce   : > { %vm870_vm1 = vmor %vm868_vm15, %vm869_vm14 }
 0x6cf   : > { %v865_v51 = vsub.f32 1.0, %v864_v50 }
 0x6d1   : > { %v866_v54 = vmul.f32 %v1245_v49, %v865_v51 }
 0x6d3   : > { %v867_v56 = vadd.f32 %v1245_v49, %v866_v54 }
 0x6d5   : > { %v871_v59 = vsel %vm870_vm1, %v1245_v49, %v867_v56 }
 0x6d6   : > { %v876_v61 = vsel %vm873_vm2, %v875_v57, %v871_v59 }
 0x6d7   : > { %v877_v62 = vmul.f32 %v876_v61, %v849_v58 }
 0x6d9   : > { %v881_v63 = vadd.f32 %v1217_v60, %v877_v62 }
 0x6db   : > { %v882_v0 = vpack.c.bf16 %v881_v63, %v881_v63 }
 0x6dd   : > { %1116 = vmatmul.msk.bf16.vlgmr.msra.gmra.mxu2 %vm451_vm0, %v882_v0 }
 0x760   : > { %v915_v5 = vpop.f32.mrf.mxu2 }
 0x761   : > { %v916_v6 = vadd.f32 %v1218_v4, %v915_v5 }
 0x763   : > { %v919_v7 = vmax.f32 %v916_v6, 0.0 }
 0x765   : > { %v920_v8 = vpack.c.bf16 %v919_v7, %v919_v7 }
 0x767   : > { %1133 = vmatmul.msk.bf16.vlgmr.msra.gmra.mxu3 %vm957_vm3, %v920_v8 }
 0x768   : > { %v917_v10 = vpop.f32.mrf.mxu2 }
 0x7ea   : > { %v970_v12 = vpop.f32.mrf.mxu3 }
 0x7eb   : > { %v971_v13 = vadd.f32 %v1219_v11, %v970_v12 }
 0x7ed   : > { %v974_v14 = vadd.f32 %v971_v13, %v1629_v26 }
 0x7ef   : > { %975 = vst.msk [vmem:[%s445_s14] sm:$0xff] %vm451_vm0, %v974_v14 }
 0x7f0   : > { %1333 = shalt.err (!%p1330_p11)
}
 0x7f1   : > { %1154 = dma.vmem_to_hbm [thread:$0]  (%p1519_p3), %s990_s20, 128, %s992_s13, %s977_s25  }
 0x7f2   : > { %v972_v15 = vpop.f32.mrf.mxu3 }
 0x7f3 PF: > { %s1733_s29 = sld [smem:[#allocation11_spill]]  ;;  %p1735_p12 = scmp.ge.s32.totalorder %s1376_s24, 2 }
 0x7f5   : > { %p1165_p13 = pnand %p1735_p12, %p1488_p6 }
 0x7f7   : > { %p1166_p0 = pneg %p1165_p13 }
 0x7f9   : > { %s1003_s21 = sand.u32 1, %s1733_s29  }
 0x7fa   : > { %s1004_s23 = scalar_lea.sflag [#allocation4], %s1003_s21 }
 0x7fb   : > { %1359 = dma.done.wait (%p1166_p0), %s1004_s23, 128  }
 0x7fc   : > { %1361 = vsyncadd (%p1166_p0), %s1004_s23, 4294967168  ;;  %s1736_s24 = sld [smem:[#allocation14_spill]]  ;;  %s1739_s21 = smov %s1368_s22 }
 0x7fd   : > { %s1737_s27 = sld [smem:[#allocation12_spill]] }
 0x7fe   : > { %s1738_s23 = sld [smem:[#allocation15_spill]] }
 0x802   : > { %p26_p5 = scmp.ge.s32.totalorder %s1736_s24, 4  }
 0x803   : > { %s1740_s22 = smov %s1737_s27 }
 0x804   :  { %28 = sbr.rel (!%p26_p5) target bundleno = 8 (0x8), region = 117 }
 0x809   :  { %1010 = vsyncpa [#allocation3], 1 }
 0x80a   :  { %1012 = vsyncpa [#allocation3 + $0x1], 1 }
 0x80b   :  { %1013 = vsyncpa [#allocation6], 1 }
 0x80c   :  { %1014 = vsyncpa [#allocation4], 1 }
 0x80d   :  { %1016 = vsyncpa [#allocation4 + $0x1], 1 }

</bundles_post_ra>
